<compile_context>
chip_gen: v5e
topology: v5e:2x2
jax: 0.10.0
libtpu: 0.0.40
codegen_flags: <defaults>
</compile_context>

<pallas_src>
import functools

import numpy as np
import jax
import jax.numpy as jnp
from jax import lax
from jax.experimental import pallas as pl
from jax.experimental.pallas import tpu as pltpu


# 48 MiB fits v7x's 64 MiB physical VMEM and leaves headroom on v5e/v6e (128 MiB).
_VMEM_LIMIT = 48 * 1024 * 1024

# Sequence tiles.  128 is the portable default (v5e-friendly); on v6e/v7x the 256-wide
# MXU benefits from ATTN_TILE_CAP = 256 (re-budget the resident bias/VMEM before raising).
ATTN_TILE_CAP = 128
PROJ_TILE_CAP = 256


def _seq_tile(n, cap):
    if n <= cap:
        return n
    assert n % cap == 0, f"sequence length {n} must be a multiple of {cap}"
    return cap


# --------------- kernel 1: LayerNorm + fused [v|gate|q|k] projection ---------------- #

def _ln_proj_kernel(x_ref, ga_ref, be_ref, w_ref, b_ref,
                    q_ref, k_ref, v_ref, gate_ref, *,
                    eps, heads, dh, ce, temperature):
    # LayerNorm in f32.
    x = x_ref[0].astype(jnp.float32)                              # (TR, C)
    mu = jnp.mean(x, axis=-1, keepdims=True)
    xc = x - mu
    var = jnp.mean(xc * xc, axis=-1, keepdims=True)
    xn = xc * lax.rsqrt(var + eps)
    xn = xn * ga_ref[...].astype(jnp.float32) + be_ref[...].astype(jnp.float32)

    # Single MXU matmul for all projections (bf16 inputs, f32 accumulation), SiLU once.
    y = jnp.dot(xn.astype(jnp.bfloat16), w_ref[...], preferred_element_type=jnp.float32)
    y = y + b_ref[...].astype(jnp.float32)
    y = y * jax.nn.sigmoid(y)                                     # SiLU on v, gate, q, k

    v_ref[0] = y[:, :ce].astype(v_ref.dtype)
    gate_ref[0] = y[:, ce:2 * ce].astype(gate_ref.dtype)

    hdh = heads * dh
    qraw = y[:, 2 * ce:2 * ce + hdh]
    kraw = y[:, 2 * ce + hdh:2 * ce + 2 * hdh]

    # Cosine (l2) normalization hoisted out of the attention inner loop; temperature is
    # folded into q so the attention hot loop carries no extra per-tile scale.
    qs, ks = [], []
    for hh in range(heads):
        qh = qraw[:, hh * dh:(hh + 1) * dh]
        kh = kraw[:, hh * dh:(hh + 1) * dh]
        qh = qh * lax.rsqrt(jnp.maximum(jnp.sum(qh * qh, -1, keepdims=True), 1e-24))
        kh = kh * lax.rsqrt(jnp.maximum(jnp.sum(kh * kh, -1, keepdims=True), 1e-24))
        qs.append(qh * temperature)
        ks.append(kh)
    q_ref[0] = jnp.concatenate(qs, axis=-1).astype(q_ref.dtype)   # head-major, lane-dense
    k_ref[0] = jnp.concatenate(ks, axis=-1).astype(k_ref.dtype)


def ln_fused_proj(x, ln_g, ln_b, w_cat, b_cat, heads, dh, ce, temperature, eps=1e-5):
    B, N, C = x.shape
    ktot = w_cat.shape[1]
    hdh = heads * dh
    tr = _seq_tile(N, PROJ_TILE_CAP)
    resident = lambda b, r: (0, 0)
    kernel = functools.partial(_ln_proj_kernel, eps=eps, heads=heads, dh=dh, ce=ce,
                               temperature=float(temperature))
    return pl.pallas_call(
        kernel,
        out_shape=(jax.ShapeDtypeStruct((B, N, hdh), jnp.bfloat16),   # q (normed * temp)
                   jax.ShapeDtypeStruct((B, N, hdh), jnp.bfloat16),   # k (normed)
                   jax.ShapeDtypeStruct((B, N, ce), jnp.bfloat16),    # v
                   jax.ShapeDtypeStruct((B, N, ce), jnp.bfloat16)),   # gate
        grid=(B, N // tr),
        in_specs=[
            pl.BlockSpec((1, tr, C), lambda b, r: (b, r, 0)),
            pl.BlockSpec((1, C), resident),
            pl.BlockSpec((1, C), resident),
            pl.BlockSpec((C, ktot), resident),    # fused weight, resident across the grid
            pl.BlockSpec((1, ktot), resident),
        ],
        out_specs=(pl.BlockSpec((1, tr, hdh), lambda b, r: (b, r, 0)),
                   pl.BlockSpec((1, tr, hdh), lambda b, r: (b, r, 0)),
                   pl.BlockSpec((1, tr, ce), lambda b, r: (b, r, 0)),
                   pl.BlockSpec((1, tr, ce), lambda b, r: (b, r, 0))),
        compiler_params=pltpu.CompilerParams(
            dimension_semantics=("parallel", "parallel"),
            vmem_limit_bytes=_VMEM_LIMIT),
    )(x, ln_g, ln_b, w_cat, b_cat)


# ------- kernel 2: flash GAU attention + gate + output projection + residual -------- #

def _gau_flash_kernel(qi_tab, ki_tab,
                      q_ref, k_ref, v_ref, gate_ref, bias_ref, x_ref, wo_ref, bo_ref,
                      o_ref, m_sc, l_sc, acc_sc, *,
                      heads, dh, dv, tile, nt, causal, g_offset):
    s_idx = pl.program_id(1)
    qi = qi_tab[s_idx]
    ki = ki_tab[s_idx]

    @pl.when(ki == 0)
    def _init():
        m_sc[...] = jnp.full_like(m_sc, -jnp.inf)
        l_sc[...] = jnp.zeros_like(l_sc)
        acc_sc[...] = jnp.zeros_like(acc_sc)

    # Bias tile depends only on the tile diagonal (qi - ki): index the VMEM-resident
    # banded table instead of streaming an (H, tq, tk) tile from HBM every step.
    gidx = (qi - ki + g_offset) * heads

    if causal:
        row = qi * tile + lax.broadcasted_iota(jnp.int32, (tile, tile), 0)
        col = ki * tile + lax.broadcasted_iota(jnp.int32, (tile, tile), 1)
        causal_neg = jnp.where(col > row, jnp.float32(-1e30), jnp.float32(0.0))

    qblk = q_ref[0]                                   # (tile, H*dh) bf16, l2-normed * temperature
    kblk = k_ref[0]                                   # (tile, H*dh) bf16, l2-normed
    vblk = v_ref[0]                                   # (tile, H*dv) bf16

    # NOTE: statically unrolled head loop; for heads >= 4 with tile = 256 watch vreg
    # pressure in the bundle dump (make heads a grid axis if it starts spilling).
    for h in range(heads):
        q = qblk[:, h * dh:(h + 1) * dh]
        k = kblk[:, h * dh:(h + 1) * dh]
        v = vblk[:, h * dv:(h + 1) * dv]
        s = lax.dot_general(q, k, (((1,), (1,)), ((), ())),
                            preferred_element_type=jnp.float32)            # (tile, tile)
        s = s + bias_ref[gidx + h]                                          # f32 bias band
        if causal:
            s = s + causal_neg

        m_prev = m_sc[h]                                                    # (tile, 1)
        m_new = jnp.maximum(m_prev, jnp.max(s, axis=-1, keepdims=True))
        alpha = jnp.exp(m_prev - m_new)
        p = jnp.exp(s - m_new)
        l_sc[h] = alpha * l_sc[h] + jnp.sum(p, axis=-1, keepdims=True)
        acc_sc[h] = alpha * acc_sc[h] + jnp.dot(p.astype(jnp.bfloat16), v,
                                                preferred_element_type=jnp.float32)
        m_sc[h] = m_new

    is_last = (ki == qi) if causal else (ki == nt - 1)

    @pl.when(is_last)
    def _finalize():
        gate = gate_ref[0]                                                  # (tile, H*dv)
        outs = []
        for h in range(heads):
            gh = gate[:, h * dv:(h + 1) * dv].astype(jnp.float32)
            # exact division (not approx EUP reciprocal): closer f32 parity, finalize-only cost
            outs.append(acc_sc[h] / l_sc[h] * gh)
        gated = jnp.concatenate(outs, axis=-1).astype(jnp.bfloat16)         # (tile, ce)
        # fused output projection + residual add (saves an HBM round trip + a pallas_call)
        y = jnp.dot(gated, wo_ref[...], preferred_element_type=jnp.float32)
        y = y + bo_ref[...].astype(jnp.float32) + x_ref[0].astype(jnp.float32)
        o_ref[0] = y.astype(o_ref.dtype)


def gau_attention_outproj(q, k, v, gate, band_bias, x, w_out, b_out,
                          heads, dh, causal, tile, g_offset):
    B, N, C = x.shape
    ce = v.shape[-1]
    dv = ce // heads
    nt = N // tile
    hdh = heads * dh

    # Enumerate only the tile pairs that need work (lower triangle for causal); the
    # scalar-prefetch tables drive all index_maps, so skipped tiles are never DMA'd.
    if causal:
        pairs = [(qi, ki) for qi in range(nt) for ki in range(qi + 1)]
    else:
        pairs = [(qi, ki) for qi in range(nt) for ki in range(nt)]
    qi_tab = jnp.asarray(np.array([p[0] for p in pairs], np.int32))
    ki_tab = jnp.asarray(np.array([p[1] for p in pairs], np.int32))
    n_steps = len(pairs)
    nbh = band_bias.shape[0]                      # n_bands * heads

    kernel = functools.partial(_gau_flash_kernel, heads=heads, dh=dh, dv=dv,
                               tile=tile, nt=nt, causal=causal, g_offset=g_offset)
    grid_spec = pltpu.PrefetchScalarGridSpec(
        num_scalar_prefetch=2,
        grid=(B, n_steps),
        in_specs=[
            pl.BlockSpec((1, tile, hdh), lambda b, s, qt, kt: (b, qt[s], 0)),   # q rows
            pl.BlockSpec((1, tile, hdh), lambda b, s, qt, kt: (b, kt[s], 0)),   # k rows
            pl.BlockSpec((1, tile, ce), lambda b, s, qt, kt: (b, kt[s], 0)),    # v rows
            pl.BlockSpec((1, tile, ce), lambda b, s, qt, kt: (b, qt[s], 0)),    # gate rows
            pl.BlockSpec((nbh, tile, tile), lambda b, s, qt, kt: (0, 0, 0)),    # bias: VMEM resident
            pl.BlockSpec((1, tile, C), lambda b, s, qt, kt: (b, qt[s], 0)),     # residual input
            pl.BlockSpec((ce, C), lambda b, s, qt, kt: (0, 0)),                 # w_out resident
            pl.BlockSpec((1, C), lambda b, s, qt, kt: (0, 0)),                  # b_out resident
        ],
        out_specs=pl.BlockSpec((1, tile, C), lambda b, s, qt, kt: (b, qt[s], 0)),
        scratch_shapes=[
            # Kept (heads, tile, 1) rather than (heads, tile): the trailing-1 lane padding
            # costs ~1 MiB VMEM at realistic sizes but keeps the softmax statistics in the
            # proven keepdims layout (no sublane<->lane relayouts in the hot loop).
            pltpu.VMEM((heads, tile, 1), jnp.float32),    # running max
            pltpu.VMEM((heads, tile, 1), jnp.float32),    # running denominator
            pltpu.VMEM((heads, tile, dv), jnp.float32),   # running accumulator
        ])
    return pl.pallas_call(
        kernel,
        out_shape=jax.ShapeDtypeStruct((B, N, C), x.dtype),
        grid_spec=grid_spec,
        compiler_params=pltpu.CompilerParams(
            dimension_semantics=("parallel", "arbitrary"),
            vmem_limit_bytes=_VMEM_LIMIT),
    )(qi_tab, ki_tab, q, k, v, gate, band_bias, x, w_out, b_out)


# ----------------------------- model glue (pure JAX) ------------------------------- #

def build_banded_bias(p, n, heads, tile, causal):
    """Diagonal-banded dynamic position bias.

    bias(i, j) = MLP(i - j); a (tile, tile) bias tile at tile coords (qi, ki) depends only
    on g = qi - ki, so the full (H, N, N) tensor never has to exist: one (H, tile, tile)
    tile per visited diagonal, kept fully resident in the attention kernel's VMEM.
    """
    # TODO(synk): for very long N / many heads the resident band (2*N/tile*H*tile^2*4 B)
    # outgrows VMEM; switch to generating the tile in-kernel from the (H, 2N-1) table.
    pos = jnp.arange(-n + 1, n, dtype=jnp.float32)[:, None]          # (2n-1, 1)
    t = jax.nn.relu(pos @ p["w0"] + p["b0"])
    t = jax.nn.relu(t @ p["w1"] + p["b1"])
    tab = (t @ p["w2"] + p["b2"]).T                                   # (heads, 2n-1) f32
    nt = n // tile
    gs = np.arange(0, nt) if causal else np.arange(-(nt - 1), nt)     # visited diagonals
    r = np.arange(tile)[:, None]
    c = np.arange(tile)[None, :]
    idx = gs[:, None, None] * tile + (r - c)[None, :, :] + (n - 1)    # (nb, tile, tile)
    band = tab[:, idx]                                                # (heads, nb, tile, tile)
    band = jnp.transpose(band, (1, 0, 2, 3))                          # (nb, heads, tile, tile)
    band = band.reshape(len(gs) * heads, tile, tile).astype(jnp.float32)
    g_offset = 0 if causal else nt - 1
    return band, g_offset


def _fuse_layer_weights(p, heads, dh):
    w_vg, b_vg = p["w_vg"], p["b_vg"]                  # (C, 2*ce), (2*ce,)
    w_qk, b_qk = p["w_qk"], p["b_qk"]                  # (C, 2*H*dh), (2*H*dh,)
    ce = w_vg.shape[1] // 2
    # reference to_query_key layout is per-head interleaved [q_h | k_h]; permute the
    # columns once (tiny, host-side indices) so the kernel emits head-major q / k slabs.
    hs = np.repeat(np.arange(heads), dh)
    ds = np.tile(np.arange(dh), heads)
    q_cols = 2 * dh * hs + ds
    k_cols = q_cols + dh
    w_cat = jnp.concatenate([w_vg[:, :ce], w_vg[:, ce:],
                             w_qk[:, q_cols], w_qk[:, k_cols]], axis=1)
    b_cat = jnp.concatenate([b_vg[:ce], b_vg[ce:], b_qk[q_cols], b_qk[k_cols]])[None, :]
    return w_cat.astype(jnp.bfloat16), b_cat.astype(jnp.float32), ce


def gau_layer(x, p, band_bias, g_offset, heads, dh, causal, tile):
    w_cat, b_cat, ce = _fuse_layer_weights(p, heads, dh)
    q, k, v, gate = ln_fused_proj(x, p["ln_g"], p["ln_b"], w_cat, b_cat,
                                  heads, dh, ce, p["temperature"])
    return gau_attention_outproj(q, k, v, gate, band_bias, x,
                                 p["w_out"], p["b_out"],
                                 heads, dh, causal, tile, g_offset)


def transformer_forward(x, params, heads, head_dim, causal=True):
    B, N, C = x.shape
    tile = _seq_tile(N, ATTN_TILE_CAP)
    band_bias, g_offset = build_banded_bias(params["pos"], N, heads, tile, causal)
    # TODO(synk): key-padding mask path (mask != None) not implemented; reference default is None.
    for p in params["layers"]:
        x = gau_layer(x, p, band_bias, g_offset, heads, head_dim, causal, tile)
    # TODO(synk): grad-checkpointing / self_conditioning are training-time hooks; forward returns (x, []).
    return x, []


# --------------------------------- parameter init ----------------------------------- #

def init_params(key, dim, depth, heads, dim_head, expansion_factor=2, temperature=15.5):
    E = expansion_factor
    pdim = dim // 4

    def dense(k, din, dout, scale=0.05, wdtype=jnp.float32):
        kw, kb = jax.random.split(k)
        w = (scale * jax.random.normal(kw, (din, dout), jnp.float32)).astype(wdtype)
        b = scale * jax.random.normal(kb, (dout,), jnp.float32)
        return w, b

    keys = jax.random.split(key, depth + 1)
    layers = []
    for i in range(depth):
        k = jax.random.split(keys[i], 3)
        w_vg, b_vg = dense(k[0], dim, dim * E * 2, wdtype=jnp.bfloat16)
        w_qk, b_qk = dense(k[1], dim, dim_head * heads * 2, wdtype=jnp.bfloat16)
        w_out, b_out = dense(k[2], dim * E, dim, wdtype=jnp.bfloat16)
        layers.append(dict(
            ln_g=jnp.ones((1, dim), jnp.float32),
            ln_b=jnp.zeros((1, dim), jnp.float32),
            w_vg=w_vg, b_vg=b_vg,
            w_qk=w_qk, b_qk=b_qk,
            w_out=w_out, b_out=b_out[None, :],
            # per-layer nn.Parameter init value; static float is valid for inference only.
            temperature=float(temperature),
        ))
    kp = jax.random.split(keys[-1], 3)
    w0, b0 = dense(kp[0], 1, pdim, scale=0.5)
    w1, b1 = dense(kp[1], pdim, pdim, scale=0.5)
    w2, b2 = dense(kp[2], pdim, heads, scale=0.5)
    return dict(layers=layers,
                pos=dict(w0=w0, b0=b0, w1=w1, b1=b1, w2=w2, b2=b2))


# --------------------------------------- main ---------------------------------------- #

if __name__ == "__main__":
    B, N = 2, 8
    dim, depth, heads, dim_head = 32, 2, 2, 16

    key = jax.random.PRNGKey(0)
    kx, kp = jax.random.split(key)
    x = jax.random.normal(kx, (B, N, dim), dtype=jnp.float32)
    params = init_params(kp, dim, depth, heads, dim_head)

    out, intermediate = transformer_forward(x, params, heads=heads, head_dim=dim_head,
                                            causal=True)
    out = jax.block_until_ready(out)
    assert out.shape == (B, N, dim) and out.dtype == jnp.float32
    assert bool(jnp.all(jnp.isfinite(out)))
    print("KERNEL_OK")
</pallas_src>

<mosaic_0001>
module attributes {stable_mosaic.version = 11 : i64} {
  func.func @_ln_proj_kernel(%arg0: i32, %arg1: i32, %arg2: memref<1x8x32xf32, #tpu.memory_space<vmem>>, %arg3: memref<1x32xf32, #tpu.memory_space<vmem>>, %arg4: memref<1x32xf32, #tpu.memory_space<vmem>>, %arg5: memref<32x192xbf16, #tpu.memory_space<vmem>>, %arg6: memref<1x192xf32, #tpu.memory_space<vmem>>, %arg7: memref<1x8x32xbf16, #tpu.memory_space<vmem>>, %arg8: memref<1x8x32xbf16, #tpu.memory_space<vmem>>, %arg9: memref<1x8x64xbf16, #tpu.memory_space<vmem>>, %arg10: memref<1x8x64xbf16, #tpu.memory_space<vmem>>) attributes {dimension_semantics = [#tpu.dimension_semantics<parallel>, #tpu.dimension_semantics<parallel>], iteration_bounds = array<i64: 2, 1>, scalar_prefetch = 0 : i64, scratch_operands = 0 : i64, tpu.core_type = #tpu.core_type<tc>, window_params = [{transform_indices = @transform_0, window_bounds = array<i64: 1, 8, 32>}, {pipeline_mode = #tpu.pipeline_mode<synchronous>, transform_indices = @transform_1, window_bounds = array<i64: 1, 32>}, {pipeline_mode = #tpu.pipeline_mode<synchronous>, transform_indices = @transform_2, window_bounds = array<i64: 1, 32>}, {pipeline_mode = #tpu.pipeline_mode<synchronous>, transform_indices = @transform_3, window_bounds = array<i64: 32, 192>}, {pipeline_mode = #tpu.pipeline_mode<synchronous>, transform_indices = @transform_4, window_bounds = array<i64: 1, 192>}, {transform_indices = @transform_5, window_bounds = array<i64: 1, 8, 32>}, {transform_indices = @transform_6, window_bounds = array<i64: 1, 8, 32>}, {transform_indices = @transform_7, window_bounds = array<i64: 1, 8, 64>}, {transform_indices = @transform_8, window_bounds = array<i64: 1, 8, 64>}]} {
    %c0 = arith.constant 0 : index
    %c0_0 = arith.constant 0 : index
    %c0_1 = arith.constant 0 : index
    %0 = vector.load %arg2[%c0, %c0_0, %c0_1] : memref<1x8x32xf32, #tpu.memory_space<vmem>>, vector<1x8x32xf32>
    %1 = vector.shape_cast %0 : vector<1x8x32xf32> to vector<8x32xf32>
    %cst = arith.constant dense<0.000000e+00> : vector<8xf32>
    %2 = vector.multi_reduction <add>, %1, %cst [1] : vector<8x32xf32> to vector<8xf32>
    %3 = vector.shape_cast %2 : vector<8xf32> to vector<8x1xf32>
    %cst_2 = arith.constant 3.200000e+01 : f32
    %4 = vector.broadcast %cst_2 : f32 to vector<8x1xf32>
    %5 = arith.divf %3, %4 : vector<8x1xf32>
    %6 = vector.broadcast %5 : vector<8x1xf32> to vector<8x32xf32>
    %7 = arith.subf %1, %6 : vector<8x32xf32>
    %8 = arith.mulf %7, %7 : vector<8x32xf32>
    %cst_3 = arith.constant dense<0.000000e+00> : vector<8xf32>
    %9 = vector.multi_reduction <add>, %8, %cst_3 [1] : vector<8x32xf32> to vector<8xf32>
    %10 = vector.shape_cast %9 : vector<8xf32> to vector<8x1xf32>
    %cst_4 = arith.constant 3.200000e+01 : f32
    %11 = vector.broadcast %cst_4 : f32 to vector<8x1xf32>
    %12 = arith.divf %10, %11 : vector<8x1xf32>
    %cst_5 = arith.constant 9.99999974E-6 : f32
    %13 = vector.broadcast %cst_5 : f32 to vector<8x1xf32>
    %14 = arith.addf %12, %13 : vector<8x1xf32>
    %15 = math.rsqrt %14 : vector<8x1xf32>
    %16 = vector.broadcast %15 : vector<8x1xf32> to vector<8x32xf32>
    %17 = arith.mulf %7, %16 : vector<8x32xf32>
    %c0_6 = arith.constant 0 : index
    %c0_7 = arith.constant 0 : index
    %18 = vector.load %arg3[%c0_6, %c0_7] : memref<1x32xf32, #tpu.memory_space<vmem>>, vector<1x32xf32>
    %19 = vector.broadcast %18 : vector<1x32xf32> to vector<8x32xf32>
    %20 = arith.mulf %17, %19 : vector<8x32xf32>
    %c0_8 = arith.constant 0 : index
    %c0_9 = arith.constant 0 : index
    %21 = vector.load %arg4[%c0_8, %c0_9] : memref<1x32xf32, #tpu.memory_space<vmem>>, vector<1x32xf32>
    %22 = vector.broadcast %21 : vector<1x32xf32> to vector<8x32xf32>
    %23 = arith.addf %20, %22 : vector<8x32xf32>
    %24 = arith.truncf %23 : vector<8x32xf32> to vector<8x32xbf16>
    %c0_10 = arith.constant 0 : index
    %c0_11 = arith.constant 0 : index
    %25 = vector.load %arg5[%c0_10, %c0_11] : memref<32x192xbf16, #tpu.memory_space<vmem>>, vector<32x192xbf16>
    %cst_12 = arith.constant dense<0.000000e+00> : vector<8x192xf32>
    %26 = tpu.matmul %24, %25, %cst_12 {dimension_numbers = #tpu.dot_dimension_numbers<[1], [0], [0], [1], [0, 0, 1, 1], [], []>} : vector<8x32xbf16>, vector<32x192xbf16>, vector<8x192xf32> -> vector<8x192xf32>
    %c0_13 = arith.constant 0 : index
    %c0_14 = arith.constant 0 : index
    %27 = vector.load %arg6[%c0_13, %c0_14] : memref<1x192xf32, #tpu.memory_space<vmem>>, vector<1x192xf32>
    %28 = vector.broadcast %27 : vector<1x192xf32> to vector<8x192xf32>
    %29 = arith.addf %26, %28 : vector<8x192xf32>
    %30 = arith.negf %29 : vector<8x192xf32>
    %31 = math.exp %30 : vector<8x192xf32>
    %cst_15 = arith.constant 1.000000e+00 : f32
    %32 = vector.broadcast %cst_15 : f32 to vector<8x192xf32>
    %33 = arith.addf %32, %31 : vector<8x192xf32>
    %34 = arith.divf %32, %33 : vector<8x192xf32>
    %35 = arith.mulf %29, %34 : vector<8x192xf32>
    %36 = vector.extract_strided_slice %35 {offsets = [0, 0], sizes = [8, 64], strides = [1, 1]} : vector<8x192xf32> to vector<8x64xf32>
    %37 = arith.truncf %36 : vector<8x64xf32> to vector<8x64xbf16>
    %c0_16 = arith.constant 0 : index
    %c0_17 = arith.constant 0 : index
    %c0_18 = arith.constant 0 : index
    %38 = vector.load %arg9[%c0_16, %c0_17, %c0_18] : memref<1x8x64xbf16, #tpu.memory_space<vmem>>, vector<1x8x64xbf16>
    %39 = vector.shape_cast %38 : vector<1x8x64xbf16> to vector<8x64xbf16>
    %40 = vector.shape_cast %37 : vector<8x64xbf16> to vector<1x8x64xbf16>
    tpu.vector_store %arg9[%c0_16, %c0_17, %c0_18], %40 {strides = array<i32>} : memref<1x8x64xbf16, #tpu.memory_space<vmem>>, vector<1x8x64xbf16>,
    %41 = vector.extract_strided_slice %35 {offsets = [0, 64], sizes = [8, 64], strides = [1, 1]} : vector<8x192xf32> to vector<8x64xf32>
    %42 = arith.truncf %41 : vector<8x64xf32> to vector<8x64xbf16>
    %c0_19 = arith.constant 0 : index
    %c0_20 = arith.constant 0 : index
    %c0_21 = arith.constant 0 : index
    %43 = vector.load %arg10[%c0_19, %c0_20, %c0_21] : memref<1x8x64xbf16, #tpu.memory_space<vmem>>, vector<1x8x64xbf16>
    %44 = vector.shape_cast %43 : vector<1x8x64xbf16> to vector<8x64xbf16>
    %45 = vector.shape_cast %42 : vector<8x64xbf16> to vector<1x8x64xbf16>
    tpu.vector_store %arg10[%c0_19, %c0_20, %c0_21], %45 {strides = array<i32>} : memref<1x8x64xbf16, #tpu.memory_space<vmem>>, vector<1x8x64xbf16>,
    %46 = vector.extract_strided_slice %35 {offsets = [0, 128], sizes = [8, 32], strides = [1, 1]} : vector<8x192xf32> to vector<8x32xf32>
    %47 = vector.extract_strided_slice %35 {offsets = [0, 160], sizes = [8, 32], strides = [1, 1]} : vector<8x192xf32> to vector<8x32xf32>
    %48 = vector.extract_strided_slice %46 {offsets = [0, 0], sizes = [8, 16], strides = [1, 1]} : vector<8x32xf32> to vector<8x16xf32>
    %49 = vector.extract_strided_slice %47 {offsets = [0, 0], sizes = [8, 16], strides = [1, 1]} : vector<8x32xf32> to vector<8x16xf32>
    %50 = arith.mulf %48, %48 : vector<8x16xf32>
    %cst_22 = arith.constant dense<0.000000e+00> : vector<8xf32>
    %51 = vector.multi_reduction <add>, %50, %cst_22 [1] : vector<8x16xf32> to vector<8xf32>
    %52 = vector.shape_cast %51 : vector<8xf32> to vector<8x1xf32>
    %cst_23 = arith.constant 1.000000e-24 : f32
    %53 = vector.broadcast %cst_23 : f32 to vector<8x1xf32>
    %54 = arith.maximumf %52, %53 : vector<8x1xf32>
    %55 = math.rsqrt %54 : vector<8x1xf32>
    %56 = vector.broadcast %55 : vector<8x1xf32> to vector<8x16xf32>
    %57 = arith.mulf %48, %56 : vector<8x16xf32>
    %58 = arith.mulf %49, %49 : vector<8x16xf32>
    %cst_24 = arith.constant dense<0.000000e+00> : vector<8xf32>
    %59 = vector.multi_reduction <add>, %58, %cst_24 [1] : vector<8x16xf32> to vector<8xf32>
    %60 = vector.shape_cast %59 : vector<8xf32> to vector<8x1xf32>
    %cst_25 = arith.constant 1.000000e-24 : f32
    %61 = vector.broadcast %cst_25 : f32 to vector<8x1xf32>
    %62 = arith.maximumf %60, %61 : vector<8x1xf32>
    %63 = math.rsqrt %62 : vector<8x1xf32>
    %64 = vector.broadcast %63 : vector<8x1xf32> to vector<8x16xf32>
    %65 = arith.mulf %49, %64 : vector<8x16xf32>
    %cst_26 = arith.constant 1.550000e+01 : f32
    %66 = vector.broadcast %cst_26 : f32 to vector<8x16xf32>
    %67 = arith.mulf %57, %66 : vector<8x16xf32>
    %68 = vector.extract_strided_slice %46 {offsets = [0, 16], sizes = [8, 16], strides = [1, 1]} : vector<8x32xf32> to vector<8x16xf32>
    %69 = vector.extract_strided_slice %47 {offsets = [0, 16], sizes = [8, 16], strides = [1, 1]} : vector<8x32xf32> to vector<8x16xf32>
    %70 = arith.mulf %68, %68 : vector<8x16xf32>
    %cst_27 = arith.constant dense<0.000000e+00> : vector<8xf32>
    %71 = vector.multi_reduction <add>, %70, %cst_27 [1] : vector<8x16xf32> to vector<8xf32>
    %72 = vector.shape_cast %71 : vector<8xf32> to vector<8x1xf32>
    %cst_28 = arith.constant 1.000000e-24 : f32
    %73 = vector.broadcast %cst_28 : f32 to vector<8x1xf32>
    %74 = arith.maximumf %72, %73 : vector<8x1xf32>
    %75 = math.rsqrt %74 : vector<8x1xf32>
    %76 = vector.broadcast %75 : vector<8x1xf32> to vector<8x16xf32>
    %77 = arith.mulf %68, %76 : vector<8x16xf32>
    %78 = arith.mulf %69, %69 : vector<8x16xf32>
    %cst_29 = arith.constant dense<0.000000e+00> : vector<8xf32>
    %79 = vector.multi_reduction <add>, %78, %cst_29 [1] : vector<8x16xf32> to vector<8xf32>
    %80 = vector.shape_cast %79 : vector<8xf32> to vector<8x1xf32>
    %cst_30 = arith.constant 1.000000e-24 : f32
    %81 = vector.broadcast %cst_30 : f32 to vector<8x1xf32>
    %82 = arith.maximumf %80, %81 : vector<8x1xf32>
    %83 = math.rsqrt %82 : vector<8x1xf32>
    %84 = vector.broadcast %83 : vector<8x1xf32> to vector<8x16xf32>
    %85 = arith.mulf %69, %84 : vector<8x16xf32>
    %cst_31 = arith.constant 1.550000e+01 : f32
    %86 = vector.broadcast %cst_31 : f32 to vector<8x16xf32>
    %87 = arith.mulf %77, %86 : vector<8x16xf32>
    %88 = tpu.concatenate %67, %87 in 1 : vector<8x16xf32>, vector<8x16xf32> -> vector<8x32xf32>
    %89 = arith.truncf %88 : vector<8x32xf32> to vector<8x32xbf16>
    %c0_32 = arith.constant 0 : index
    %c0_33 = arith.constant 0 : index
    %c0_34 = arith.constant 0 : index
    %90 = vector.load %arg7[%c0_32, %c0_33, %c0_34] : memref<1x8x32xbf16, #tpu.memory_space<vmem>>, vector<1x8x32xbf16>
    %91 = vector.shape_cast %90 : vector<1x8x32xbf16> to vector<8x32xbf16>
    %92 = vector.shape_cast %89 : vector<8x32xbf16> to vector<1x8x32xbf16>
    tpu.vector_store %arg7[%c0_32, %c0_33, %c0_34], %92 {strides = array<i32>} : memref<1x8x32xbf16, #tpu.memory_space<vmem>>, vector<1x8x32xbf16>,
    %93 = tpu.concatenate %65, %85 in 1 : vector<8x16xf32>, vector<8x16xf32> -> vector<8x32xf32>
    %94 = arith.truncf %93 : vector<8x32xf32> to vector<8x32xbf16>
    %c0_35 = arith.constant 0 : index
    %c0_36 = arith.constant 0 : index
    %c0_37 = arith.constant 0 : index
    %95 = vector.load %arg8[%c0_35, %c0_36, %c0_37] : memref<1x8x32xbf16, #tpu.memory_space<vmem>>, vector<1x8x32xbf16>
    %96 = vector.shape_cast %95 : vector<1x8x32xbf16> to vector<8x32xbf16>
    %97 = vector.shape_cast %94 : vector<8x32xbf16> to vector<1x8x32xbf16>
    tpu.vector_store %arg8[%c0_35, %c0_36, %c0_37], %97 {strides = array<i32>} : memref<1x8x32xbf16, #tpu.memory_space<vmem>>, vector<1x8x32xbf16>,
    return
  }
  func.func @transform_0(%arg0: i32, %arg1: i32) -> (i32, i32, i32) {
    %c0_i32 = arith.constant 0 : i32
    %c0_i32_0 = arith.constant 0 : i32
    return %arg0, %arg1, %c0_i32 : i32, i32, i32
  }
  func.func @transform_1(%arg0: i32, %arg1: i32) -> (i32, i32) {
    %c0_i32 = arith.constant 0 : i32
    %c0_i32_0 = arith.constant 0 : i32
    %c0_i32_1 = arith.constant 0 : i32
    return %c0_i32, %c0_i32_0 : i32, i32
  }
  func.func @transform_2(%arg0: i32, %arg1: i32) -> (i32, i32) {
    %c0_i32 = arith.constant 0 : i32
    %c0_i32_0 = arith.constant 0 : i32
    %c0_i32_1 = arith.constant 0 : i32
    return %c0_i32, %c0_i32_0 : i32, i32
  }
  func.func @transform_3(%arg0: i32, %arg1: i32) -> (i32, i32) {
    %c0_i32 = arith.constant 0 : i32
    %c0_i32_0 = arith.constant 0 : i32
    %c0_i32_1 = arith.constant 0 : i32
    return %c0_i32, %c0_i32_0 : i32, i32
  }
  func.func @transform_4(%arg0: i32, %arg1: i32) -> (i32, i32) {
    %c0_i32 = arith.constant 0 : i32
    %c0_i32_0 = arith.constant 0 : i32
    %c0_i32_1 = arith.constant 0 : i32
    return %c0_i32, %c0_i32_0 : i32, i32
  }
  func.func @transform_5(%arg0: i32, %arg1: i32) -> (i32, i32, i32) {
    %c0_i32 = arith.constant 0 : i32
    %c0_i32_0 = arith.constant 0 : i32
    return %arg0, %arg1, %c0_i32 : i32, i32, i32
  }
  func.func @transform_6(%arg0: i32, %arg1: i32) -> (i32, i32, i32) {
    %c0_i32 = arith.constant 0 : i32
    %c0_i32_0 = arith.constant 0 : i32
    return %arg0, %arg1, %c0_i32 : i32, i32, i32
  }
  func.func @transform_7(%arg0: i32, %arg1: i32) -> (i32, i32, i32) {
    %c0_i32 = arith.constant 0 : i32
    %c0_i32_0 = arith.constant 0 : i32
    return %arg0, %arg1, %c0_i32 : i32, i32, i32
  }
  func.func @transform_8(%arg0: i32, %arg1: i32) -> (i32, i32, i32) {
    %c0_i32 = arith.constant 0 : i32
    %c0_i32_0 = arith.constant 0 : i32
    return %arg0, %arg1, %c0_i32 : i32, i32, i32
  }
}

</mosaic_0001>

<bundles_post_ra>
// kernel: tpu_custom_call.1
= control target key start
LH: loop header
LB: loop body
LE: loop exit
PB: predicated region body
PF: predicated region fallthrough
CT: control target
= control target key end

     0   :  { %s1677_s0 = inlined_call_operand.hbm [shape: f32[2,8,32], index: 0, kind: input, shape index: {}]   ;;  %s1678_s1 = inlined_call_operand.hbm [shape: f32[1,32], index: 1, kind: input, shape index: {}]   ;;  %s1679_s2 = inlined_call_operand.vmem [shape: f32[1,32], index: 2, kind: input, shape index: {}]   ;;  %s1680_s3 = inlined_call_operand.hbm [shape: bf16[32,192], index: 3, kind: input, shape index: {}]   ;;  %s1681_s4 = inlined_call_operand.vmem [shape: f32[1,192], index: 4, kind: input, shape index: {}]   ;;  %s1682_s5 = inlined_call_operand.hbm [shape: bf16[2,8,32], index: 5, kind: output, shape index: {0}]   ;;  %s1683_s6 = inlined_call_operand.hbm [shape: bf16[2,8,32], index: 6, kind: output, shape index: {1}]   ;;  %s1684_s7 = inlined_call_operand.hbm [shape: bf16[2,8,64], index: 7, kind: output, shape index: {2}]   ;;  %s1685_s8 = inlined_call_operand.hbm [shape: bf16[2,8,64], index: 8, kind: output, shape index: {3}]  }
   0x1   :  { %1689 = sst [smem:[#allocation20_spill]] %s1677_s0 }
   0x2   :  { %1690 = sst [smem:[#allocation21_spill]] %s1678_s1 }
   0x3   :  { %1691 = sst [smem:[#allocation22_spill]] %s1679_s2 }
   0x4   :  { %1692 = sst [smem:[#allocation23_spill]] %s1680_s3 }
   0x5   :  { %14 = vsyncpa [#allocation3], 0 }
   0x6   :  { %16 = vsyncpa [#allocation3 + $0x1], 0 }
   0x7   :  { %17 = vsyncpa [#allocation6], 0 }
   0x8   :  { %18 = vsyncpa [#allocation4], 0 }
   0x9   :  { %20 = vsyncpa [#allocation4 + $0x1], 0 }
   0xa   :  { %21 = vsyncpa [#allocation10], 0 }
   0xb   :  { %23 = vsyncpa [#allocation10 + $0x1], 0 }
   0xc   :  { %24 = vsyncpa [#allocation13], 0 }
   0xd   :  { %26 = vsyncpa [#allocation13 + $0x1], 0  ;;  %s1425_s27 = smov 0   ;;  %s1427_s28 = smov 0  }
   0xe   :  { %s1429_s29 = smov 0   ;;  %s1431_s30 = smov 0  }
   0xf   :  { %s1433_s9 = smov 0   ;;  %s1435_s10 = smov 0  }
  0x10 LB: > { %s1456_s11 = sadd.s32 4294967295, %s1369_s10   ;;  %s1686_s12 = sadd.s32 4294967294, %s1369_s10   ;;  %s1369_s10 = sphi %s1435_s10, %s32_s10   ;;  %s1365_s9 = sphi %s1433_s9, %s1709_s9   ;;  %s1361_s30 = sphi %s1431_s30, %s1708_s30   ;;  %s1357_s29 = sphi %s1429_s29, %s1707_s29   ;;  %s1353_s28 = sphi %s1427_s28, %s1706_s28   ;;  %s1349_s27 = sphi %s1425_s27, %s1705_s27  }
  0x11   : > { %p66_p0 = scmp.ne.s32.totalorder %s1353_s28, %s1349_s27  ;;  %p67_p1 = scmp.eq.s32.totalorder %s1456_s11, 0 }
  0x12   : > { %p182_p2 = scmp.eq.s32.totalorder %s1686_s12, 1  ;;  %p921_p4 = scmp.ge.s32.totalorder %s1369_s10, 1 }
  0x13   : > { %p1466_p3 = por %p67_p1, %p66_p0  ;;  %p273_p6 = scmp.lt.s32.totalorder %s1369_s10, 3 }
  0x14   : > { %p1471_p5 = por %p182_p2, %p66_p0  ;;  %s1696_s1 = sld [smem:[#allocation21_spill]] }
  0x15   : > { %p1479_p7 = pnand %p921_p4, %p273_p6  ;;  %p924_p8 = scmp.ge.s32.totalorder %s1369_s10, 2 }
  0x16   : > { %s1694_s14 = scalar_select %p1471_p5, 1, 0 }
  0x17   : > { %p987_p9 = pneg %p1479_p7  ;;  %s1371_s19 = smov [#allocation5]  }
  0x18   : > { %1695 = sst [smem:[#allocation19_spill]] %s1694_s14  ;;  %s287_s20 = sshll.u32 %s1371_s19, 4  ;;  %s288_s20 = int_to_ptr.vmem [resolvable:$true] %s287_s20 }
  0x19   : > { %s1698_s3 = sld [smem:[#allocation23_spill]]  ;;  %p988_p10 = pnand %p987_p9, %p67_p1 }
  0x1a   : > { %s285_s17 = sshll.u32 %s1696_s1, 4  ;;  %s1372_s24 = smov [#allocation7]   ;;  %s286_s17 = int_to_ptr.hbm [resolvable:$true] %s285_s17 }
  0x1b   : > { %s301_s25 = sshll.u32 %s1372_s24, 4  ;;  %s1373_s26 = smov 128   ;;  %s302_s25 = int_to_ptr.vmem [resolvable:$true] %s301_s25 }
  0x1c   : > { %990 = dma.hbm_to_vmem [thread:$0]  (!%p988_p10), %s286_s17, 16, %s288_s20, [#allocation6]  }
  0x1d   : > { %s1374_s15 = smov 8   ;;  %p176_p11 = scmp.eq.s32.totalorder %s1456_s11, 1 }
  0x1e   : > { %s44_s16 = sadd.s32 1, %s1365_s9  ;;  %s53_s19 = sadd.s32 1, %s1357_s29 }
  0x1f   : > { %s299_s23 = sshll.u32 %s1698_s3, 4  ;;  %p46_p12 = scmp.ge.s32.totalorder %s44_s16, 2  ;;  %s300_s23 = int_to_ptr.hbm [resolvable:$true] %s299_s23 }
  0x20   : > { %993 = dma.hbm_to_vmem [thread:$0]  (!%p988_p10), %s300_s23, 512, %s302_s25, [#allocation6], %s1373_s26, %s1373_s26, %s1374_s15  }
  0x21   : > { %p60_p13 = scmp.ne.s32.totalorder %s1357_s29, %s1353_s28  ;;  %p61_p0 = scmp.eq.s32.totalorder %s1369_s10, 0 }
  0x22   : > { %s1711_s16 = smov (%p46_p12, %s44_s16), 0  ;;  %p1013_p4 = scmp.lt.s32.totalorder %s1369_s10, 2 }
  0x23   : > { %p1499_p2 = por %p176_p11, %p60_p13  ;;  %s48_s17 = ssub.s32 %s1365_s9, %s1711_s16 }
  0x24   : > { %s318_s20 = sand.u32 1, %s1357_s29   ;;  %p51_p6 = scmp.eq.s32.totalorder %s48_s17, 0 }
  0x25   : > { %p62_p9 = por %p61_p0, %p60_p13  ;;  %s925_s22 = sshll.u32 %s318_s20, 3 }
  0x26   : > { %s926_s23 = sshll.u32 %s1365_s9, 3  ;;  %s1700_s0 = sld [smem:[#allocation20_spill]] }
  0x27   : > { %s1509_s24 = scalar_select %p51_p6, %s1357_s29, %s53_s19  }
  0x28   : > { %s322_s1 = scalar_lea.vmem [#allocation2], %s925_s22  ;;  %p995_p10 = pnand %p1013_p4, %p62_p9 }
  0x29   : > { %s331_s3 = sshll.u32 %s322_s1, 4  ;;  %s319_s14 = scalar_lea.sflag [#allocation3], %s318_s20  ;;  %s332_s3 = int_to_ptr.vmem [resolvable:$true] %s331_s3 }
  0x2a   : > { %340 = sbr.rel (%p1479_p7) target bundleno = 857 (0x359), region = 40  ;;  %s1519_s19 = sand.u32 (!%p1479_p7), 1, %s1353_s28  }
  0x2b   : > { %s928_s17 = sshll.u32 (!%p1479_p7), %s1519_s19, 3 }
  0x2c   : > { %s327_s15 = scalar_lea.hbm %s1700_s0, %s926_s23  ;;  %s343_s23 = scalar_lea.sflag (!%p1479_p7), [#allocation3], %s1519_s19 }
  0x2d   : > { %s329_s12 = sshll.u32 %s327_s15, 4  ;;  %s346_s25 = scalar_lea.vmem (!%p1479_p7), [#allocation2], %s928_s17  ;;  %s330_s12 = int_to_ptr.hbm [resolvable:$true] %s329_s12 }
  0x2e   : > { %997 = dma.hbm_to_vmem [thread:$0]  (!%p995_p10), %s330_s12, 128, %s332_s3, %s319_s14  }
  0x2f   : > { %1328 = dma.done.wait (%p1466_p3), %s343_s23, 128  }
  0x30   : > { %1330 = vsyncadd (%p1466_p3), %s343_s23, 4294967168 }
  0x31   : > { %1332 = dma.done.wait (%p67_p1), [#allocation6], 528  }
  0x32   : > { %1334 = vsyncadd (%p67_p1), [#allocation6], 4294966768  ;;  %vm407_vm0 = vcmask 261120   ;;  %v406_v0 = vld [vmem:[%s346_s25] sm:$0xff]  ;;  %v1375_v2 = vmov 32.0   ;;  %s1701_s2 = sld [smem:[#allocation22_spill]] }
  0x33   : > { %v408_v1 = vsel %vm407_vm0, %v406_v0, 0.0  ;;  %1081 = vrcp.f32 %v1375_v2  ;;  %v945_v14 = vld [vmem:[#allocation7 + $0x10] sm:$0xf]  ;;  %v968_v15 = vld [vmem:[#allocation7 + $0x14] sm:$0xf0]  ;;  %s1542_s14 = sshll.u32 %s1519_s19, 2 }
  0x34   : > { %409 = vadd.xlane.f32.xlu0 %v408_v1  ;;  %v967_v16 = vld [vmem:[#allocation7 + $0x14] sm:$0xf]  ;;  %v946_v17 = vor.u32 %v968_v15, %v945_v14  ;;  %v947_v18 = vld [vmem:[#allocation7 + $0x18] sm:$0xf0]  ;;  %v937_v19 = vld [vmem:[#allocation7] sm:$0xf] }
  0x35   : > { %v966_v20 = vld [vmem:[#allocation7 + $0x4] sm:$0xf0]  ;;  %v950_v21 = vor.u32 %v967_v16, %v947_v18  ;;  %v965_v22 = vld [vmem:[#allocation7 + $0x4] sm:$0xf]  ;;  %v939_v23 = vld [vmem:[#allocation7 + $0x8] sm:$0xf0] }
  0x36   : > { %487 = vmatpush.bf16.msra.mxu0 %v946_v17  ;;  %v938_v24 = vor.u32 %v966_v20, %v937_v19  ;;  %v942_v25 = vor.u32 %v965_v22, %v939_v23  ;;  %v1079_v35 = vld [vmem:[#allocation5] ss:$0 sm:$0xff]  ;;  %v452_v42 = vld [vmem:[%s1681_s4] sm:$0x3]  ;;  %vm548_vm13 = vcmask 519168   ;;  %s1688_s18 = scalar_lea.vmem [#allocation11], %s1542_s14 }
  0x37   : > { %500 = vmatpush.bf16.msra.mxu1 %v950_v21  ;;  %v454_v43 = vperm.slane %v452_v42, 0  ;;  %v455_v44 = vperm.slane %v452_v42, 1  ;;  %s1376_s20 = smov 112   ;;  %s1377_s22 = smov 96   ;;  %vm556_vm14 = vcmask 130048  }
  0x38   : > { %v1080_v38 = vld [vmem:[%s1701_s2] ss:$0 sm:$0xff]  ;;  %s1378_s26 = smov 80   ;;  %s1379_s15 = smov 64  }
  0x39   : > { %v1082_v3 = vpop.eup %1081  ;;  %s1558_s17 = sshll.u32 %s1361_s30, 2  ;;  %s404_s30 = scalar_lea.vmem [#allocation12], %s1542_s14 }
  0x3a   : > { %v412_v4 = vmul.f32 32.0, %v1082_v3  ;;  %vm416_vm1 = vweird.f32 %v1082_v3  ;;  %488 = vmatpush.bf16.msra.mxu0 %v938_v24  ;;  %s716_s1 = scalar_lea.hbm %s1685_s8, %s1558_s17  ;;  %s1567_s3 = sshll.u32 %s404_s30, 4  ;;  %s719_s3 = int_to_ptr.vmem [resolvable:$true] %s1567_s3 }
  0x3b   : > { %501 = vmatpush.bf16.msra.mxu1 %v942_v25  ;;  %s1569_s12 = sshll.u32 %s716_s1, 4  ;;  %s721_s12 = int_to_ptr.hbm [resolvable:$true] %s1569_s12 }
  0x3c   : > { %v413_v5 = vsub.f32 1.0, %v412_v4 }
  0x3e   : > { %v414_v6 = vmul.f32 %v1082_v3, %v413_v5 }
  0x40   : > { %v415_v7 = vadd.f32 %v1082_v3, %v414_v6 }
  0x42   : > { %v417_v8 = vsel %vm416_vm1, %v1082_v3, %v415_v7 }
  0xa7   : > { %v410_v9 = vpop.xlane.xlu0 %409 }
  0xa8   : > { %v418_v10 = vmul.f32 %v417_v8, %v410_v9 }
  0xaa   : > { %v419_v11 = vsub.f32 %v406_v0, %v418_v10 }
  0xac   : > { %v420_v12 = vmul.f32 %v419_v11, %v419_v11 }
  0xae   : > { %v421_v13 = vsel %vm407_vm0, %v420_v12, 0.0 }
  0xaf   : > { %422 = vadd.xlane.f32.xlu0 %v421_v13 }
 0x122   : > { %v423_v26 = vpop.xlane.xlu0 %422 }
 0x123   : > { %v424_v27 = vmul.f32 %v423_v26, %v417_v8 }
 0x125   : > { %v425_v28 = vadd.f32 1e-05, %v424_v27 }
 0x127   : > { %1083 = vrsqrt.f32 %v425_v28  ;;  %vm432_vm3 = vweird.f32 %v425_v28 }
 0x12d   : > { %v1084_v29 = vpop.eup %1083 }
 0x12e   : > { %v427_v30 = vmul.f32 %v1084_v29, %v425_v28  ;;  %vm433_vm2 = vweird.f32 %v1084_v29 }
 0x12f   : > { %vm434_vm4 = vmor %vm432_vm3, %vm433_vm2 }
 0x130   : > { %v428_v31 = vmul.f32 %v1084_v29, %v427_v30 }
 0x132   : > { %v429_v32 = vmul.f32 0.5, %v428_v31 }
 0x134   : > { %v430_v33 = vsub.f32 1.5, %v429_v32 }
 0x136   : > { %v431_v34 = vmul.f32 %v1084_v29, %v430_v33 }
 0x138   : > { %v435_v36 = vsel %vm434_vm4, %v1084_v29, %v431_v34 }
 0x139   : > { %v436_v37 = vmul.f32 %v435_v36, %v419_v11 }
 0x13b   : > { %v441_v39 = vmul.f32 %v1079_v35, %v436_v37 }
 0x13d   : > { %v446_v40 = vadd.f32 %v1080_v38, %v441_v39 }
 0x13f   : > { %v447_v41 = vpack.c.bf16 %v446_v40, %v446_v40 }
 0x141   : > { %951 = vmatmul.msk.bf16.vlgmr.msra.gmra.mxu0 %vm407_vm0, %v447_v41  ;;  %952 = vmatmul.msk.bf16.vlgmr.msra.gmra.mxu1 %vm407_vm0, %v447_v41 }
 0x1be   : > { %v490_v45 = vpop.f32.mrf.mxu0  ;;  %v503_v46 = vpop.f32.mrf.mxu1 }
 0x1bf   : > { %v491_v47 = vadd.f32 %v490_v45, %v454_v43  ;;  %v504_v48 = vadd.f32 %v503_v46, %v455_v44 }
 0x1c1   : > { %v953_v49 = vmul.f32 -1.442695, %v491_v47  ;;  %v954_v50 = vmul.f32 -1.442695, %v504_v48 }
 0x1c3   : > { %1085 = vpow2.f32 %v953_v49 }
 0x1c4   : > { %1087 = vpow2.f32 %v954_v50 }
 0x1c6   : > { %v492_v51 = vpop.f32.mrf.mxu0  ;;  %v505_v52 = vpop.f32.mrf.mxu1 }
 0x1c9   : > { %v1086_v53 = vpop.eup %1085 }
 0x1ca   : > { %v1088_v54 = vpop.eup %1087  ;;  %v513_v55 = vadd.f32 1.0, %v1086_v53 }
 0x1cb   : > { %v514_v56 = vadd.f32 1.0, %v1088_v54 }
 0x1cc   : > { %1089 = vrcp.f32 %v513_v55  ;;  %v526_v62 = vand.u32 2147483648, %v513_v55  ;;  %v524_v1 = vand.u32 2147483647, %v513_v55  ;;  %vm520_vm7 = vweird.f32 %v513_v55 }
 0x1cd   : > { %1091 = vrcp.f32 %v514_v56  ;;  %v541_v2 = vand.u32 2147483648, %v514_v56  ;;  %v539_v4 = vand.u32 2147483647, %v514_v56  ;;  %vm535_vm9 = vweird.f32 %v514_v56 }
 0x1ce   : > { %v527_v6 = vor.u32 1.1754944e-38, %v526_v62  ;;  %vm525_vm10 = vcmp.eq.f32.partialorder %v524_v1, 8.507059e+37 }
 0x1cf   : > { %v542_v9 = vor.u32 1.1754944e-38, %v541_v2  ;;  %vm540_vm12 = vcmp.eq.f32.partialorder %v539_v4, 8.507059e+37 }
 0x1d2   : > { %v1090_v57 = vpop.eup %1089 }
 0x1d3   : > { %v1092_v58 = vpop.eup %1091  ;;  %v516_v59 = vmul.f32 %v1090_v57, %v513_v55  ;;  %vm521_vm5 = vweird.f32 %v1090_v57 }
 0x1d4   : > { %v531_v60 = vmul.f32 %v1092_v58, %v514_v56  ;;  %vm536_vm6 = vweird.f32 %v1092_v58  ;;  %vm522_vm8 = vmor %vm520_vm7, %vm521_vm5 }
 0x1d5   : > { %v517_v61 = vsub.f32 1.0, %v516_v59  ;;  %vm537_vm11 = vmor %vm535_vm9, %vm536_vm6 }
 0x1d6   : > { %v532_v63 = vsub.f32 1.0, %v531_v60 }
 0x1d7   : > { %v518_v0 = vmul.f32 %v1090_v57, %v517_v61 }
 0x1d8   : > { %v533_v3 = vmul.f32 %v1092_v58, %v532_v63 }
 0x1d9   : > { %v519_v5 = vadd.f32 %v1090_v57, %v518_v0 }
 0x1da   : > { %v534_v7 = vadd.f32 %v1092_v58, %v533_v3 }
 0x1db   : > { %v523_v8 = vsel %vm522_vm8, %v1090_v57, %v519_v5 }
 0x1dc   : > { %v528_v10 = vsel %vm525_vm10, %v527_v6, %v523_v8  ;;  %v538_v11 = vsel %vm537_vm11, %v1092_v58, %v534_v7 }
 0x1dd   : > { %v545_v12 = vmul.f32 %v528_v10, %v491_v47  ;;  %v543_v13 = vsel %vm540_vm12, %v542_v9, %v538_v11 }
 0x1de   : > { %v1544_v14 = vmul.f32 %v543_v13, %v504_v48 }
 0x1df   : > { %v547_v15 = vpack.c.bf16 %v545_v12, %v545_v12 }
 0x1e0   : > { %v555_v16 = vmul.f32 %v1544_v14, %v1544_v14 }
 0x1e1   : > { %549 = vst.msk [vmem:[%s1688_s18] sm:$0xf] %vm548_vm13, %v547_v15  ;;  %s1211_s18 = scalar_lea.hbm %s1685_s8, 8 }
 0x1e2   : > { %592 = vrot.lane.b32.xlu2 %v555_v16, %s1376_s20  ;;  %573 = vrot.lane.b32.xlu1 %v555_v16, %s1377_s22  ;;  %v557_v17 = vsel %vm556_vm14, %v555_v16, 0.0 }
 0x1ea   : > { %610 = vrot.lane.b32.xlu1 %v555_v16, %s1378_s26  ;;  %s671_s26 = scalar_lea.hbm %s1682_s5, %s1558_s17 }
 0x214   : > { %558 = vadd.xlane.f32.xlu1 %v557_v17 }
 0x23c   : > { %v593_v22 = vpop.permute.xlu2 %592 }
 0x23d   : > { %v595_v23 = vsel %vm556_vm14, %v593_v22, 0.0 }
 0x254   : > { %v574_v18 = vpop.permute.xlu1 %573 }
 0x255   : > { %v576_v19 = vsel %vm556_vm14, %v574_v18, 0.0 }
 0x256   : > { %577 = vadd.xlane.f32.xlu2 %v576_v19 }
 0x25c   : > { %v611_v20 = vpop.permute.xlu1 %610 }
 0x25d   : > { %v613_v21 = vsel %vm556_vm14, %v611_v20, 0.0 }
 0x25e   : > { %614 = vadd.xlane.f32.xlu0 %v613_v21 }
 0x266   : > { %596 = vadd.xlane.f32.xlu0 %v595_v23 }
 0x27a   : > { %551 = vrot.lane.b32.xlu0 %v547_v15, %s1379_s15  ;;  %s660_s15 = scalar_lea.sflag [#allocation13], %s1519_s19 }
 0x287   : > { %v559_v24 = vpop.xlane.xlu1 %558 }
 0x288   : > { %v560_v25 = vmax.f32 %v559_v24, 1e-24 }
 0x28a   : > { %1093 = vrsqrt.f32 %v560_v25  ;;  %vm567_vm6 = vweird.f32 %v560_v25 }
 0x290   : > { %v1094_v28 = vpop.eup %1093 }
 0x291   : > { %v562_v33 = vmul.f32 %v1094_v28, %v560_v25  ;;  %vm568_vm5 = vweird.f32 %v1094_v28 }
 0x292   : > { %vm569_vm7 = vmor %vm567_vm6, %vm568_vm5 }
 0x293   : > { %v563_v36 = vmul.f32 %v1094_v28, %v562_v33 }
 0x295   : > { %v564_v42 = vmul.f32 0.5, %v563_v36 }
 0x297   : > { %v565_v46 = vsub.f32 1.5, %v564_v42 }
 0x299   : > { %v566_v52 = vmul.f32 %v1094_v28, %v565_v46 }
 0x29b   : > { %v570_v59 = vsel %vm569_vm7, %v1094_v28, %v566_v52 }
 0x29c   : > { %v571_v62 = vmul.f32 %v570_v59, %v1544_v14 }
 0x2c9   : > { %v578_v26 = vpop.xlane.xlu2 %577 }
 0x2ca   : > { %v579_v27 = vmax.f32 %v578_v26, 1e-24 }
 0x2cc   : > { %1095 = vrsqrt.f32 %v579_v27  ;;  %vm586_vm0 = vweird.f32 %v579_v27 }
 0x2d1   : > { %v615_v29 = vpop.xlane.xlu0 %614 }
 0x2d2   : > { %v1096_v30 = vpop.eup %1095  ;;  %v616_v31 = vmax.f32 %v615_v29, 1e-24 }
 0x2d3   : > { %v581_v32 = vmul.f32 %v1096_v30, %v579_v27  ;;  %vm587_vm15 = vweird.f32 %v1096_v30 }
 0x2d4   : > { %1097 = vrsqrt.f32 %v616_v31  ;;  %vm588_vm2 = vmor %vm586_vm0, %vm587_vm15  ;;  %vm623_vm3 = vweird.f32 %v616_v31 }
 0x2d5   : > { %v582_v34 = vmul.f32 %v1096_v30, %v581_v32 }
 0x2d7   : > { %v583_v35 = vmul.f32 0.5, %v582_v34 }
 0x2d9   : > { %v597_v37 = vpop.xlane.xlu0 %596  ;;  %v584_v40 = vsub.f32 1.5, %v583_v35 }
 0x2da   : > { %v1098_v38 = vpop.eup %1097  ;;  %v598_v39 = vmax.f32 %v597_v37, 1e-24 }
 0x2db   : > { %v618_v41 = vmul.f32 %v1098_v38, %v616_v31  ;;  %v585_v44 = vmul.f32 %v1096_v30, %v584_v40  ;;  %vm624_vm1 = vweird.f32 %v1098_v38 }
 0x2dc   : > { %1099 = vrsqrt.f32 %v598_v39  ;;  %vm625_vm4 = vmor %vm623_vm3, %vm624_vm1  ;;  %vm605_vm9 = vweird.f32 %v598_v39 }
 0x2dd   : > { %v619_v43 = vmul.f32 %v1098_v38, %v618_v41  ;;  %v589_v51 = vsel %vm588_vm2, %v1096_v30, %v585_v44 }
 0x2de   : > { %v590_v55 = vmul.f32 %v589_v51, %v1544_v14 }
 0x2df   : > { %v620_v45 = vmul.f32 0.5, %v619_v43 }
 0x2e1   : > { %v621_v47 = vsub.f32 1.5, %v620_v45 }
 0x2e2   : > { %v1100_v48 = vpop.eup %1099 }
 0x2e3   : > { %v622_v49 = vmul.f32 %v1098_v38, %v621_v47  ;;  %v600_v50 = vmul.f32 %v1100_v48, %v598_v39  ;;  %vm606_vm8 = vweird.f32 %v1100_v48 }
 0x2e4   : > { %vm607_vm10 = vmor %vm605_vm9, %vm606_vm8 }
 0x2e5   : > { %v601_v53 = vmul.f32 %v1100_v48, %v600_v50  ;;  %v626_v54 = vsel %vm625_vm4, %v1098_v38, %v622_v49 }
 0x2e6   : > { %v627_v56 = vmul.f32 %v626_v54, %v1544_v14 }
 0x2e7   : > { %v602_v57 = vmul.f32 0.5, %v601_v53 }
 0x2e8   : > { %v1074_v58 = vpack.i.bf16 %v627_v56, %v590_v55 }
 0x2e9   : > { %v603_v60 = vsub.f32 1.5, %v602_v57 }
 0x2ea   : > { %1075 = vrot.lane.b32.xlu2 %v1074_v58, %s1377_s22  ;;  %s1205_s22 = sshra.s32 %s721_s12, 4  ;;  %s1206_s22 = int_to_ptr.hbm [resolvable:$true] %s1205_s22 }
 0x2eb   : > { %v604_v61 = vmul.f32 %v1100_v48, %v603_v60  ;;  %s1207_s23 = scalar_lea.hbm %s1206_s22, 4  ;;  %p1212_p11 = scmp.lt.s32.totalorder %s1206_s22, %s1685_s8 }
 0x2ec   : > { %v552_v63 = vpop.permute.xlu0 %551  ;;  %p1208_p1 = scmp.ne.s32.totalorder %s1206_s22, %s1207_s23  ;;  %p1213_p12 = scmp.lt.s32.totalorder %s1211_s18, %s1207_s23 }
 0x2ed   : > { %v608_v0 = vsel %vm607_vm10, %v1100_v48, %v604_v61  ;;  %554 = vst.msk [vmem:[%s404_s30] sm:$0xf] %vm548_vm13, %v552_v63 }
 0x2ee   : > { %v609_v1 = vmul.f32 %v608_v0, %v1544_v14  ;;  %p1209_p3 = pnand %p1208_p1, %p1499_p2  ;;  %p1214_p13 = por %p1213_p12, %p1212_p11 }
 0x2f0   : > { %p1210_p7 = pneg %p1209_p3 }
 0x2f2   : > { %p1215_p0 = pnand %p1214_p13, %p1210_p7 }
 0x2f4   : > { %1218 = shalt.err (!%p1215_p0)
}
 0x2f5   : > { %982 = dma.vmem_to_hbm [thread:$0]  (%p1499_p2), %s719_s3, 64, %s721_s12, %s660_s15   ;;  %v591_v2 = vmul.f32 15.5, %v571_v62  ;;  %v628_v3 = vmul.f32 15.5, %v609_v1  ;;  %vm631_vm11 = vcmask 257024  }
 0x2f6   : > { %s383_s13 = scalar_lea.vmem [#allocation8], %s1542_s14  ;;  %s675_s25 = sshll.u32 %s671_s26, 4  ;;  %s676_s25 = int_to_ptr.hbm [resolvable:$true] %s675_s25 }
 0x2f7   : > { %s673_s20 = sshll.u32 %s383_s13, 4  ;;  %v629_v4 = vsel %vm556_vm14, %v591_v2, %v628_v3  ;;  %s645_s0 = scalar_lea.sflag [#allocation4], %s1519_s19  ;;  %s674_s20 = int_to_ptr.vmem [resolvable:$true] %s673_s20 }
 0x2f8   : > { %v630_v5 = vpack.c.bf16 %v629_v4, %v629_v4  ;;  %s1233_s18 = sshra.s32 %s676_s25, 4  ;;  %s1239_s26 = scalar_lea.hbm %s1682_s5, 8  ;;  %s1234_s18 = int_to_ptr.hbm [resolvable:$true] %s1233_s18 }
 0x2f9   : > { %s1235_s22 = scalar_lea.hbm %s1234_s18, 4  ;;  %p1240_p10 = scmp.lt.s32.totalorder %s1234_s18, %s1682_s5 }
 0x2fa   : > { %632 = vst.msk [vmem:[%s383_s13] sm:$0xf] %vm631_vm11, %v630_v5  ;;  %p1236_p4 = scmp.ne.s32.totalorder %s1234_s18, %s1235_s22  ;;  %p1241_p1 = scmp.lt.s32.totalorder %s1239_s26, %s1235_s22 }
 0x2fc   : > { %p1237_p6 = pnand %p1236_p4, %p1499_p2  ;;  %p1242_p3 = por %p1241_p1, %p1240_p10 }
 0x2fe   : > { %p1238_p9 = pneg %p1237_p6 }
 0x300   : > { %p1243_p7 = pnand %p1242_p3, %p1238_p9 }
 0x302   : > { %1246 = shalt.err (!%p1243_p7)
}
 0x303   : > { %979 = dma.vmem_to_hbm [thread:$0]  (%p1499_p2), %s674_s20, 64, %s676_s25, %s645_s0  }
 0x304   : > { %s686_s30 = scalar_lea.hbm %s1683_s6, %s1558_s17  ;;  %s701_s18 = scalar_lea.hbm %s1684_s7, %s1558_s17 }
 0x305   : > { %s649_s22 = sand.u32 1, %s1456_s11   ;;  %s390_s12 = scalar_lea.vmem [#allocation9], %s1542_s14 }
 0x306   : > { %s688_s26 = sshll.u32 %s390_s12, 4  ;;  %s690_s15 = sshll.u32 %s686_s30, 4  ;;  %s689_s26 = int_to_ptr.vmem [resolvable:$true] %s688_s26  ;;  %s691_s15 = int_to_ptr.hbm [resolvable:$true] %s690_s15 }
 0x307   : > { %s1702_s23 = scalar_lea.vmem [#allocation11], %s1542_s14  ;;  %s1620_s20 = sshll.u32 %s701_s18, 4  ;;  %s706_s20 = int_to_ptr.hbm [resolvable:$true] %s1620_s20 }
 0x308   : > { %s1618_s2 = sshll.u32 %s1702_s23, 4  ;;  %s650_s11 = scalar_lea.sflag [#allocation10], %s649_s22  ;;  %s704_s2 = int_to_ptr.vmem [resolvable:$true] %s1618_s2 }
 0x309   : > { %s1261_s17 = sshra.s32 %s691_s15, 4  ;;  %s1267_s19 = scalar_lea.hbm %s1683_s6, 8  ;;  %s1262_s17 = int_to_ptr.hbm [resolvable:$true] %s1261_s17 }
 0x30a   : > { %s1263_s25 = scalar_lea.hbm %s1262_s17, 4  ;;  %p1268_p0 = scmp.lt.s32.totalorder %s1262_s17, %s1683_s6 }
 0x30b   : > { %p1264_p11 = scmp.ne.s32.totalorder %s1262_s17, %s1263_s25  ;;  %p1269_p4 = scmp.lt.s32.totalorder %s1267_s19, %s1263_s25 }
 0x30d   : > { %p1265_p12 = pnand %p1264_p11, %p1499_p2  ;;  %p1270_p6 = por %p1269_p4, %p1268_p0 }
 0x30f   : > { %p1266_p13 = pneg %p1265_p12 }
 0x311   : > { %p1271_p9 = pnand %p1270_p6, %p1266_p13 }
 0x344   : > { %v1076_v6 = vpop.permute.xlu2 %1075 }
 0x345   : > { %v1078_v7 = vunpack.i.h.bf16 %v1076_v6  ;;  %v1077_v8 = vunpack.i.l.bf16 %v1076_v6 }
 0x347   : > { %v641_v9 = vsel %vm556_vm14, %v1077_v8, %v1078_v7 }
 0x348   : > { %v642_v10 = vpack.c.bf16 %v641_v9, %v641_v9 }
 0x34a   : > { %643 = vst.msk [vmem:[%s390_s12] sm:$0xf] %vm631_vm11, %v642_v10 }
 0x34b   : > { %1274 = shalt.err (!%p1271_p9)
}
 0x34c   : > { %980 = dma.vmem_to_hbm [thread:$0]  (%p1499_p2), %s689_s26, 64, %s691_s15, %s650_s11  }
 0x34d   : > { %s1289_s13 = sshra.s32 %s706_s20, 4  ;;  %s1295_s12 = scalar_lea.hbm %s1684_s7, 8  ;;  %s1290_s13 = int_to_ptr.hbm [resolvable:$true] %s1289_s13 }
 0x34e   : > { %s1291_s3 = scalar_lea.hbm %s1290_s13, 4  ;;  %p1296_p7 = scmp.lt.s32.totalorder %s1290_s13, %s1684_s7 }
 0x34f   : > { %p1292_p10 = scmp.ne.s32.totalorder %s1290_s13, %s1291_s3  ;;  %p1297_p11 = scmp.lt.s32.totalorder %s1295_s12, %s1291_s3 }
 0x351   : > { %p1293_p1 = pnand %p1292_p10, %p1499_p2  ;;  %p1298_p12 = por %p1297_p11, %p1296_p7 }
 0x353   : > { %p1294_p3 = pneg %p1293_p1 }
 0x355   : > { %p1299_p13 = pnand %p1298_p12, %p1294_p3 }
 0x357   : > { %1302 = shalt.err (!%p1299_p13)
}
 0x358   : > { %981 = dma.vmem_to_hbm [thread:$0]  (%p1499_p2), %s704_s2, 64, %s706_s20, %s650_s11  }
 0x359 PF: > { %s732_s15 = sand.u32 1, %s1349_s27   ;;  %p999_p0 = pnand %p924_p8, %p1471_p5 }
 0x35a   : > { %s733_s25 = scalar_lea.sflag [#allocation4], %s732_s15 }
 0x35b   : > { %p1000_p4 = pneg %p999_p0 }
 0x35d   : > { %1336 = dma.done.wait (%p1000_p4), %s733_s25, 64  }
 0x35e   : > { %1338 = vsyncadd (%p1000_p4), %s733_s25, 4294967232  ;;  %s1704_s14 = sadd.s32 4294967294, %s1369_s10  }
 0x35f   : > { %s742_s21 = sand.u32 1, %s1704_s14  }
 0x360   : > { %s743_s0 = scalar_lea.sflag [#allocation10], %s742_s21 }
 0x361   : > { %1340 = dma.done.wait (%p1000_p4), %s743_s0, 128  }
 0x362   : > { %1342 = vsyncadd (%p1000_p4), %s743_s0, 4294967168  ;;  %s763_s19 = scalar_lea.sflag [#allocation13], %s732_s15 }
 0x363   : > { %1344 = dma.done.wait (%p1000_p4), %s763_s19, 64  }
 0x364   : > { %1346 = vsyncadd (%p1000_p4), %s763_s19, 4294967232  ;;  %s32_s10 = sadd.s32 1, %s1369_s10   ;;  %s1705_s27 = smov %s1353_s28 }
 0x365   : > { %p29_p2 = scmp.ge.s32.totalorder %s32_s10, 4   ;;  %s1706_s28 = smov %s1357_s29 }
 0x366   : > { %s1707_s29 = smov %s1509_s24  ;;  %s1708_s30 = smov %s1365_s9 }
 0x367   : > { %s1709_s9 = smov %s1711_s16  ;;  %31 = sbr.rel (!%p29_p2) target bundleno = 16 (0x10), region = 142 }
 0x36c   :  { %769 = vsyncpa [#allocation3], 1 }
 0x36d   :  { %771 = vsyncpa [#allocation3 + $0x1], 1 }
 0x36e   :  { %772 = vsyncpa [#allocation6], 1 }
 0x36f   :  { %773 = vsyncpa [#allocation4], 1 }
 0x370   :  { %775 = vsyncpa [#allocation4 + $0x1], 1 }
 0x371   :  { %776 = vsyncpa [#allocation10], 1 }
 0x372   :  { %778 = vsyncpa [#allocation10 + $0x1], 1 }
 0x373   :  { %779 = vsyncpa [#allocation13], 1 }
 0x374   :  { %781 = vsyncpa [#allocation13 + $0x1], 1 }

</bundles_post_ra>
